<compile_context>
chip_gen: v5e
topology: v5e:2x2
jax: 0.10.0
libtpu: 0.0.40
codegen_flags: <defaults>
</compile_context>

<pallas_src>
import jax
import jax.numpy as jnp
from jax.experimental import pallas as pl
from jax.experimental.pallas import tpu as pltpu


def _copy_kernel(x_ref, o_ref):
    # Pure pass-through: load the VMEM tile, store it back.
    o_ref[...] = x_ref[...]


def identity(x):
    """Identity.forward semantics: y = x. Zero-cost pass-through."""
    return x


def _pick_lane_width(total):
    """Largest multiple of 128 (<= 1024) that divides `total`, or 0."""
    upper = min(total, 1024)
    for k in range(upper - (upper % 128), 0, -128):
        if total % k == 0:
            return k
    return 0


def identity_copy(x):
    """Identity that returns a freshly materialized copy via a Pallas kernel."""
    total = x.size
    if total == 0:
        return x

    K = _pick_lane_width(total)

    if K == 0:
        # Small / irregular tensor (size not divisible by 128): single
        # whole-array block (block_shape == full dims is always legal).
        ndim = x.ndim
        return pl.pallas_call(
            _copy_kernel,
            out_shape=jax.ShapeDtypeStruct(x.shape, x.dtype),
            in_specs=[pl.BlockSpec(x.shape, lambda *_: (0,) * ndim)],
            out_specs=pl.BlockSpec(x.shape, lambda *_: (0,) * ndim),
        )(x)

    M = total // K
    x2 = x.reshape(M, K)

    # Sublane block: ~2 MiB per tile (dtype-aware), multiple of 8, or the full
    # extent when the array is small.
    itemsize = jnp.dtype(x.dtype).itemsize
    target_tile_bytes = 2 << 20
    bm_cap = max(8, (target_tile_bytes // (K * itemsize)) // 8 * 8)
    bm = M if M <= bm_cap else bm_cap

    grid = (pl.cdiv(M, bm),)

    y2 = pl.pallas_call(
        _copy_kernel,
        out_shape=jax.ShapeDtypeStruct((M, K), x.dtype),
        grid=grid,
        in_specs=[pl.BlockSpec((bm, K), lambda i: (i, 0))],
        out_specs=pl.BlockSpec((bm, K), lambda i: (i, 0)),
        compiler_params=pltpu.CompilerParams(
            dimension_semantics=("parallel",)),
    )(x2)
    return y2.reshape(x.shape)


if __name__ == "__main__":
    key = jax.random.PRNGKey(0)

    # Small NCHW input consistent with how Identity is used in DomainBed
    # (it replaces the final fc of a CNN featurizer; forward is shape-agnostic).
    x = jax.random.normal(key, (2, 4, 16, 16), dtype=jnp.float32)

    # True identity: zero-cost pass-through.
    y_passthrough = identity(x)
    assert y_passthrough is x

    # Materialized-copy Pallas kernel (lane-dense tiled path).
    y = identity_copy(x)
    jax.block_until_ready(y)
    assert y.shape == x.shape and y.dtype == x.dtype
    assert bool(jnp.array_equal(y, x))

    # Irregular size exercises the whole-array fallback path.
    x_odd = jax.random.normal(jax.random.PRNGKey(1), (3, 5, 7), dtype=jnp.float32)
    y_odd = identity_copy(x_odd)
    jax.block_until_ready(y_odd)
    assert y_odd.shape == x_odd.shape and y_odd.dtype == x_odd.dtype
    assert bool(jnp.array_equal(y_odd, x_odd))

    # bf16 path exercises dtype-aware tile sizing.
    x_bf16 = jax.random.normal(jax.random.PRNGKey(2), (4, 8, 32), dtype=jnp.bfloat16)
    y_bf16 = identity_copy(x_bf16)
    jax.block_until_ready(y_bf16)
    assert y_bf16.shape == x_bf16.shape and y_bf16.dtype == x_bf16.dtype
    assert bool(jnp.array_equal(y_bf16, x_bf16))

    print("KERNEL_OK")
</pallas_src>

<mosaic_0001>
module attributes {stable_mosaic.version = 11 : i64} {
  func.func @_copy_kernel(%arg0: i32, %arg1: memref<2x1024xf32, #tpu.memory_space<vmem>>, %arg2: memref<2x1024xf32, #tpu.memory_space<vmem>>) attributes {dimension_semantics = [#tpu.dimension_semantics<parallel>], iteration_bounds = array<i64: 1>, scalar_prefetch = 0 : i64, scratch_operands = 0 : i64, tpu.core_type = #tpu.core_type<tc>, window_params = [{transform_indices = @transform_0, window_bounds = array<i64: 2, 1024>}, {transform_indices = @transform_1, window_bounds = array<i64: 2, 1024>}]} {
    %c0 = arith.constant 0 : index
    %c0_0 = arith.constant 0 : index
    %0 = vector.load %arg1[%c0, %c0_0] : memref<2x1024xf32, #tpu.memory_space<vmem>>, vector<2x1024xf32>
    %c0_1 = arith.constant 0 : index
    %c0_2 = arith.constant 0 : index
    %1 = vector.load %arg2[%c0_1, %c0_2] : memref<2x1024xf32, #tpu.memory_space<vmem>>, vector<2x1024xf32>
    tpu.vector_store %arg2[%c0_1, %c0_2], %0 {strides = array<i32>} : memref<2x1024xf32, #tpu.memory_space<vmem>>, vector<2x1024xf32>,
    return
  }
  func.func @transform_0(%arg0: i32) -> (i32, i32) {
    %c0_i32 = arith.constant 0 : i32
    %c0_i32_0 = arith.constant 0 : i32
    return %arg0, %c0_i32 : i32, i32
  }
  func.func @transform_1(%arg0: i32) -> (i32, i32) {
    %c0_i32 = arith.constant 0 : i32
    %c0_i32_0 = arith.constant 0 : i32
    return %arg0, %c0_i32 : i32, i32
  }
}

</mosaic_0001>

<bundles_post_ra>
// kernel: tpu_custom_call.1
= control target key start
LH: loop header
LB: loop body
LE: loop exit
PB: predicated region body
PF: predicated region fallthrough
CT: control target
= control target key end

     0   :  { %6 = vsyncpa [#allocation3], 0  ;;  %s116_s0 = inlined_call_operand.hbm [shape: f32[2,1024], index: 0, kind: input, shape index: {}]   ;;  %s117_s1 = inlined_call_operand.hbm [shape: f32[2,1024], index: 1, kind: output, shape index: {}]  }
   0x1   :  { %7 = vsyncpa [#allocation4], 0  ;;  %s13_s8 = sshll.u32 %s116_s0, 4  ;;  %s98_s9 = smov [#allocation2]   ;;  %s14_s8 = int_to_ptr.hbm [resolvable:$true] %s13_s8 }
   0x2   :  { %s15_s10 = sshll.u32 %s98_s9, 4  ;;  %s16_s10 = int_to_ptr.vmem [resolvable:$true] %s15_s10 }
   0x3   :  { %18 = dma.hbm_to_vmem [thread:$0]  %s14_s8, 256, %s16_s10, [#allocation3]  }
   0x4   :  { %94 = dma.done.wait [#allocation3], 256  }
   0x5   :  { %95 = vsyncadd [#allocation3], 4294967040  ;;  %s99_s11 = smov [#allocation5]   ;;  %s34_s15 = sshll.u32 %s117_s1, 4  ;;  %v23_v0 = vld [vmem:[#allocation2] sm:$0xff]  ;;  %v24_v1 = vld [vmem:[#allocation2 + $0x8] sm:$0xff]  ;;  %s35_s15 = int_to_ptr.hbm [resolvable:$true] %s34_s15 }
   0x6   :  { %s32_s12 = sshll.u32 %s99_s11, 4  ;;  %25 = vst [vmem:[#allocation5] sm:$0xff] %v23_v0  ;;  %s33_s12 = int_to_ptr.vmem [resolvable:$true] %s32_s12 }
   0x7   :  { %26 = vst [vmem:[#allocation5 + $0x8] sm:$0xff] %v24_v1 }
   0x8   :  { %37 = dma.vmem_to_hbm [thread:$0]  %s33_s12, 256, %s35_s15, [#allocation4]  }
   0x9   :  { %96 = dma.done.wait [#allocation4], 256  }
   0xa   :  { %97 = vsyncadd [#allocation4], 4294967040 }
   0xb   :  { %42 = vsyncpa [#allocation3], 1 }
   0xc   :  { %43 = vsyncpa [#allocation4], 1 }

</bundles_post_ra>
